<compile_context>
chip_gen: v6e
topology: v6e:2x2x1
jax: 0.10.0
libtpu: 0.0.40
codegen_flags: <defaults>
</compile_context>

<pallas_src>
import jax
import jax.numpy as jnp
import numpy as np
from jax.experimental import pallas as pl
from jax.experimental.pallas import tpu as pltpu


def _segments(n_node: int, k: int):
    """Replicates the segment logic of Readout.forward exactly."""
    if k <= 0 or n_node // k == 0:
        raise ValueError(
            f"Readout requires 1 <= k <= n_node (got k={k}, n_node={n_node})")
    step = n_node // k
    segs = []
    i = 0
    while i < n_node:
        if n_node - i < 2 * step:
            segs.append((i, n_node - i))
            break
        segs.append((i, step))
        i += step
    return segs


def _round_up(x: int, m: int) -> int:
    return ((x + m - 1) // m) * m


def _vmem_capacity_bytes() -> int:
    """Best-effort physical-VMEM query; conservative (v7x-class) fallback."""
    try:
        cap = int(pltpu.get_tpu_info().vmem_capacity_bytes)
        if cap >= (32 << 20):
            return cap
    except Exception:
        pass
    return 64 << 20


def readout(Z: jax.Array, k: int, *, node_tile: int | None = None,
            z_buffers: int | None = None) -> jax.Array:
    """Pallas implementation of Readout(k).forward(Z). Z: (n_node, d)."""
    n_node, d = Z.shape
    segs = _segments(n_node, k)
    num_seg = len(segs)
    num_seg_p = _round_up(num_seg, 8)           # sublane-aligned accumulator rows
    itemsize = jnp.dtype(Z.dtype).itemsize
    sub_mult = max(8, 32 // itemsize)           # sublane packing granule of Z dtype

    # ---- feature (lane) tiling: parallel axis --------------------------------
    if d % 512 == 0 and d > 512:
        TD = 512
    elif d % 256 == 0:
        TD = 256
    elif d % 128 == 0:
        TD = 128
    else:
        TD = d                                   # full-d block (lane-dense output)
    grid_d = d // TD

    # ---- node (reduction) tiling: generation-aware budget, padded-lane math --
    lane_pad = _round_up(max(TD, 128), 128)      # true VMEM lane width of a Z tile
    per_row_bytes = lane_pad * itemsize
    vmem_cap = _vmem_capacity_bytes()
    z_tile_budget = (6 << 20) if vmem_cap <= (64 << 20) else (8 << 20)
    tn_cap = max(128, ((z_tile_budget // per_row_bytes) // 128) * 128)

    if node_tile is not None:
        TN = max(sub_mult, _round_up(int(node_tile), sub_mult))
    elif n_node <= tn_cap:
        TN = _round_up(n_node, sub_mult)         # single node tile
    else:
        TN = tn_cap                              # multiple of 128
    grid_n = -(-n_node // TN)
    n_cols = grid_n * TN                         # padded node extent
    ragged = (n_cols != n_node)

    # ---- explicit scoped-VMEM limit (double-buffered working set + headroom) -
    z_tile_bytes = TN * per_row_bytes
    out_tile_bytes = num_seg_p * lane_pad * itemsize
    acc_bytes = num_seg_p * lane_pad * 4
    working = 2 * z_tile_bytes + 2 * out_tile_bytes + acc_bytes + (1 << 20)
    vmem_limit = int(min(vmem_cap // 2, max(32 << 20, working + (8 << 20))))

    # ---- tiny per-segment scalar inputs (replace the dense W matrix) ---------
    start_np = np.zeros((num_seg_p, 1), np.int32)
    end_np = np.zeros((num_seg_p, 1), np.int32)
    inv_np = np.zeros((num_seg_p, 1), np.float32)
    for s, (st, ln) in enumerate(segs):
        start_np[s, 0] = st
        end_np[s, 0] = st + ln
        inv_np[s, 0] = 1.0 / float(ln)
    seg_start = jnp.asarray(start_np)
    seg_end = jnp.asarray(end_np)
    seg_inv = jnp.asarray(inv_np)

    def kernel(start_ref, end_ref, inv_ref, z_ref, o_ref, acc_ref):
        kk = pl.program_id(1)

        @pl.when(kk == 0)
        def _init():
            acc_ref[...] = jnp.zeros_like(acc_ref)

        # Build the 0/1 segment-indicator tile in-kernel (a few VPU ops on an
        # (num_seg_p, TN) slab) in Z's native dtype -> MXU stays on bf16 path.
        col = jax.lax.broadcasted_iota(jnp.int32, (num_seg_p, TN), 1) + kk * TN
        ind = ((col >= start_ref[...]) & (col < end_ref[...])).astype(z_ref.dtype)

        def accumulate(z):
            acc_ref[...] += jnp.dot(ind, z, preferred_element_type=jnp.float32)

        if ragged:
            last = pl.num_programs(1) - 1

            @pl.when(kk < last)
            def _steady():                        # no mask in steady state
                accumulate(z_ref[...])

            @pl.when(kk == last)
            def _tail():                          # mask undefined OOB rows once
                row = jax.lax.broadcasted_iota(jnp.int32, (TN, 1), 0) + kk * TN
                z = jnp.where(row < n_node, z_ref[...],
                              jnp.array(0, z_ref.dtype))
                accumulate(z)
        else:
            accumulate(z_ref[...])

        @pl.when(kk == pl.num_programs(1) - 1)
        def _finalize():
            o_ref[...] = (acc_ref[...] * inv_ref[...]).astype(o_ref.dtype)

    z_spec_kwargs = {}
    if z_buffers is not None:                     # deepen Z pipeline if needed
        z_spec_kwargs["pipeline_mode"] = pl.Buffered(int(z_buffers))

    cost = pl.CostEstimate(
        flops=2 * num_seg_p * n_cols * d,
        transcendentals=0,
        bytes_accessed=int(n_node * d * itemsize + num_seg_p * d * itemsize
                           + 3 * num_seg_p * 4),
    )

    out = pl.pallas_call(
        kernel,
        out_shape=jax.ShapeDtypeStruct((num_seg_p, d), Z.dtype),
        grid_spec=pltpu.PrefetchScalarGridSpec(
            num_scalar_prefetch=0,
            grid=(grid_d, grid_n),
            in_specs=[
                pl.BlockSpec((num_seg_p, 1), lambda j, kk: (0, 0)),  # seg start
                pl.BlockSpec((num_seg_p, 1), lambda j, kk: (0, 0)),  # seg end
                pl.BlockSpec((num_seg_p, 1), lambda j, kk: (0, 0)),  # 1/len
                pl.BlockSpec((TN, TD), lambda j, kk: (kk, j),        # Z tile
                             **z_spec_kwargs),
            ],
            out_specs=pl.BlockSpec((num_seg_p, TD), lambda j, kk: (0, j)),
            scratch_shapes=[pltpu.VMEM((num_seg_p, TD), jnp.float32)],
        ),
        compiler_params=pltpu.CompilerParams(
            dimension_semantics=("parallel", "arbitrary"),
            vmem_limit_bytes=vmem_limit),
        cost_estimate=cost,
    )(seg_start, seg_end, seg_inv, Z)

    # torch.cat(dim=0) of 1-D means + .view(1, -1)  ==  row-major flatten.
    return out[:num_seg].reshape(1, num_seg * d)


def readout_reference(Z: jax.Array, k: int) -> jax.Array:
    """Pure-JAX reference mirroring the PyTorch code, for verification."""
    segs = _segments(Z.shape[0], k)
    parts = [jnp.mean(Z[s:s + l], axis=0) for (s, l) in segs]
    return jnp.concatenate(parts, axis=0).reshape(1, -1)


if __name__ == "__main__":
    key = jax.random.PRNGKey(0)

    # (n_node, d, k, dtype, node_tile_override)
    cases = [
        (16, 32, 4, jnp.float32, None),    # harness shape: step=4, 4 segments
        (19, 32, 4, jnp.float32, None),    # remainder segment + ragged tail
        (300, 32, 3, jnp.float32, 128),    # multi-tile node reduction, ragged
        (64, 256, 4, jnp.float32, None),   # TD=256 lane block
        (300, 128, 5, jnp.bfloat16, None), # bf16 path: indicator dot + f32 acc
    ]

    for idx, (n_node, d, k, dtype, node_tile) in enumerate(cases):
        Zf = jax.random.normal(jax.random.fold_in(key, idx), (n_node, d),
                               dtype=jnp.float32)
        Z = Zf.astype(dtype)
        out = jax.block_until_ready(readout(Z, k, node_tile=node_tile))
        ref = readout_reference(Z.astype(jnp.float32), k)
        tol = 1e-5 if dtype == jnp.float32 else 3e-2
        assert out.shape == ref.shape, (out.shape, ref.shape)
        assert jnp.allclose(out.astype(jnp.float32), ref, atol=tol, rtol=tol), \
            f"mismatch vs reference for case {(n_node, d, k, dtype)}"

    print("KERNEL_OK")
</pallas_src>

<mosaic_0001>
module attributes {stable_mosaic.version = 11 : i64} {
  func.func @kernel(%arg0: i32, %arg1: i32, %arg2: memref<8x1xi32, #tpu.memory_space<vmem>>, %arg3: memref<8x1xi32, #tpu.memory_space<vmem>>, %arg4: memref<8x1xf32, #tpu.memory_space<vmem>>, %arg5: memref<16x32xf32, #tpu.memory_space<vmem>>, %arg6: memref<8x32xf32, #tpu.memory_space<vmem>>, %arg7: memref<8x32xf32, #tpu.memory_space<vmem>>) attributes {dimension_semantics = [#tpu.dimension_semantics<parallel>, #tpu.dimension_semantics<arbitrary>], iteration_bounds = array<i64: 1, 1>, scalar_prefetch = 0 : i64, scratch_operands = 1 : i64, tpu.core_type = #tpu.core_type<tc>, window_params = [{pipeline_mode = #tpu.pipeline_mode<synchronous>, transform_indices = @transform_0, window_bounds = array<i64: 8, 1>}, {pipeline_mode = #tpu.pipeline_mode<synchronous>, transform_indices = @transform_1, window_bounds = array<i64: 8, 1>}, {pipeline_mode = #tpu.pipeline_mode<synchronous>, transform_indices = @transform_2, window_bounds = array<i64: 8, 1>}, {transform_indices = @transform_3, window_bounds = array<i64: 16, 32>}, {transform_indices = @transform_4, window_bounds = array<i64: 8, 32>}]} {
    %c0_i32 = arith.constant 0 : i32
    %0 = arith.cmpi eq, %arg1, %c0_i32 : i32
    %1 = arith.extui %0 : i1 to i32
    %c0_i32_0 = arith.constant 0 : i32
    %2 = arith.cmpi ne, %1, %c0_i32_0 : i32
    scf.if %2 {
      %cst_12 = arith.constant 0.000000e+00 : f32
      %24 = vector.broadcast %cst_12 : f32 to vector<8x32xf32>
      %c0_13 = arith.constant 0 : index
      %c0_14 = arith.constant 0 : index
      %25 = vector.load %arg7[%c0_13, %c0_14] : memref<8x32xf32, #tpu.memory_space<vmem>>, vector<8x32xf32>
      tpu.vector_store %arg7[%c0_13, %c0_14], %24 {strides = array<i32>} : memref<8x32xf32, #tpu.memory_space<vmem>>, vector<8x32xf32>,
    } else {
    }
    %3 = tpu.iota {dimensions = array<i32: 1>} : vector<8x16xi32>
    %c16_i32 = arith.constant 16 : i32
    %4 = arith.muli %arg1, %c16_i32 : i32
    %5 = vector.broadcast %4 : i32 to vector<8x16xi32>
    %6 = arith.addi %3, %5 : vector<8x16xi32>
    %c0 = arith.constant 0 : index
    %c0_1 = arith.constant 0 : index
    %7 = vector.load %arg2[%c0, %c0_1] : memref<8x1xi32, #tpu.memory_space<vmem>>, vector<8x1xi32>
    %8 = vector.broadcast %7 : vector<8x1xi32> to vector<8x16xi32>
    %9 = arith.cmpi sge, %6, %8 : vector<8x16xi32>
    %c0_2 = arith.constant 0 : index
    %c0_3 = arith.constant 0 : index
    %10 = vector.load %arg3[%c0_2, %c0_3] : memref<8x1xi32, #tpu.memory_space<vmem>>, vector<8x1xi32>
    %11 = vector.broadcast %10 : vector<8x1xi32> to vector<8x16xi32>
    %12 = arith.cmpi slt, %6, %11 : vector<8x16xi32>
    %13 = arith.andi %9, %12 : vector<8x16xi1>
    %14 = arith.extui %13 : vector<8x16xi1> to vector<8x16xi32>
    %15 = arith.sitofp %14 : vector<8x16xi32> to vector<8x16xf32>
    %c0_4 = arith.constant 0 : index
    %c0_5 = arith.constant 0 : index
    %16 = vector.load %arg5[%c0_4, %c0_5] : memref<16x32xf32, #tpu.memory_space<vmem>>, vector<16x32xf32>
    %c0_6 = arith.constant 0 : index
    %c0_7 = arith.constant 0 : index
    %17 = vector.load %arg7[%c0_6, %c0_7] : memref<8x32xf32, #tpu.memory_space<vmem>>, vector<8x32xf32>
    %cst = arith.constant dense<0.000000e+00> : vector<8x32xf32>
    %18 = tpu.matmul %15, %16, %cst {dimension_numbers = #tpu.dot_dimension_numbers<[1], [0], [0], [1], [0, 0, 1, 1], [], []>} : vector<8x16xf32>, vector<16x32xf32>, vector<8x32xf32> -> vector<8x32xf32>
    %19 = arith.addf %17, %18 : vector<8x32xf32>
    %c0_8 = arith.constant 0 : index
    %c0_9 = arith.constant 0 : index
    %20 = vector.load %arg7[%c0_8, %c0_9] : memref<8x32xf32, #tpu.memory_space<vmem>>, vector<8x32xf32>
    tpu.vector_store %arg7[%c0_8, %c0_9], %19 {strides = array<i32>} : memref<8x32xf32, #tpu.memory_space<vmem>>, vector<8x32xf32>,
    %c0_i32_10 = arith.constant 0 : i32
    %21 = arith.cmpi eq, %arg1, %c0_i32_10 : i32
    %22 = arith.extui %21 : i1 to i32
    %c0_i32_11 = arith.constant 0 : i32
    %23 = arith.cmpi ne, %22, %c0_i32_11 : i32
    scf.if %23 {
      %c0_12 = arith.constant 0 : index
      %c0_13 = arith.constant 0 : index
      %24 = vector.load %arg7[%c0_12, %c0_13] : memref<8x32xf32, #tpu.memory_space<vmem>>, vector<8x32xf32>
      %c0_14 = arith.constant 0 : index
      %c0_15 = arith.constant 0 : index
      %25 = vector.load %arg4[%c0_14, %c0_15] : memref<8x1xf32, #tpu.memory_space<vmem>>, vector<8x1xf32>
      %26 = vector.broadcast %25 : vector<8x1xf32> to vector<8x32xf32>
      %27 = arith.mulf %24, %26 : vector<8x32xf32>
      %c0_16 = arith.constant 0 : index
      %c0_17 = arith.constant 0 : index
      %28 = vector.load %arg6[%c0_16, %c0_17] : memref<8x32xf32, #tpu.memory_space<vmem>>, vector<8x32xf32>
      tpu.vector_store %arg6[%c0_16, %c0_17], %27 {strides = array<i32>} : memref<8x32xf32, #tpu.memory_space<vmem>>, vector<8x32xf32>,
    } else {
    }
    return
  }
  func.func @transform_0(%arg0: i32, %arg1: i32) -> (i32, i32) {
    %c0_i32 = arith.constant 0 : i32
    %c0_i32_0 = arith.constant 0 : i32
    %c0_i32_1 = arith.constant 0 : i32
    return %c0_i32, %c0_i32_0 : i32, i32
  }
  func.func @transform_1(%arg0: i32, %arg1: i32) -> (i32, i32) {
    %c0_i32 = arith.constant 0 : i32
    %c0_i32_0 = arith.constant 0 : i32
    %c0_i32_1 = arith.constant 0 : i32
    return %c0_i32, %c0_i32_0 : i32, i32
  }
  func.func @transform_2(%arg0: i32, %arg1: i32) -> (i32, i32) {
    %c0_i32 = arith.constant 0 : i32
    %c0_i32_0 = arith.constant 0 : i32
    %c0_i32_1 = arith.constant 0 : i32
    return %c0_i32, %c0_i32_0 : i32, i32
  }
  func.func @transform_3(%arg0: i32, %arg1: i32) -> (i32, i32) {
    %c0_i32 = arith.constant 0 : i32
    return %arg1, %arg0 : i32, i32
  }
  func.func @transform_4(%arg0: i32, %arg1: i32) -> (i32, i32) {
    %c0_i32 = arith.constant 0 : i32
    %c0_i32_0 = arith.constant 0 : i32
    return %c0_i32, %arg0 : i32, i32
  }
}

</mosaic_0001>

<bundles_post_ra>
// kernel: tpu_custom_call.1
= control target key start
LH: loop header
LB: loop body
LE: loop exit
PB: predicated region body
PF: predicated region fallthrough
CT: control target
= control target key end

     0   :  { %s238_s0 = inlined_call_operand.vmem [shape: s32[8,1], index: 0, kind: input, shape index: {}]   ;;  %s239_s1 = inlined_call_operand.vmem [shape: s32[8,1], index: 1, kind: input, shape index: {}]   ;;  %s240_s2 = inlined_call_operand.vmem [shape: f32[8,1], index: 2, kind: input, shape index: {}]   ;;  %s241_s3 = inlined_call_operand.vmem [shape: f32[16,32], index: 3, kind: input, shape index: {}]   ;;  %s242_s4 = inlined_call_operand.hbm [shape: f32[8,32], index: 4, kind: output, shape index: {}]  }
   0x1   :  { %v29_v0 = vld [vmem:[%s238_s0] sm:$0xff] }
   0x2   :  { %9 = vsyncpa [#allocation4], 0  ;;  %v188_v1 = vmov 0   ;;  %v189_v2 = vmov 0.0   ;;  %v43_v3 = vld [vmem:[%s241_s3 + $0x8] sm:$0xff]  ;;  %v34_v4 = vld [vmem:[%s239_s1] sm:$0xff]  ;;  %v24_v7 = vlaneseq }
   0x3   :  { %164 = vset.pattern.permute.xlu0 %v188_v1  ;;  %153 = vmatprep.subr.mxu0 %v189_v2  ;;  %v42_v5 = vld [vmem:[%s241_s3] sm:$0xff]  ;;  %vm190_vm0 = vmmov 0   ;;  %vm22_vm1 = vcmask 261120   ;;  %vm45_vm4 = vcmask 130048   ;;  %s191_s1 = smov [#allocation3]  }
   0x4   :  { %31 = vperm.xlu0 %164, %v29_v0   ;;  %154 = vmatpush3.msra.mxu0 %v43_v3  ;;  %v126_v6 = vld [vmem:[%s240_s2] sm:$0xff]  ;;  %23 = vst.msk [vmem:[#allocation2] sm:$0xff] %vm22_vm1, %v189_v2  ;;  %v25_v9 = vand.u32 127, %v24_v7  ;;  %s140_s2 = sshll.u32 %s191_s1, 4  ;;  %s141_s2 = int_to_ptr.vmem [resolvable:$true] %s140_s2 }
   0x5   :  { %155 = vmatprep.subr.mxu0 %v189_v2  ;;  %165 = vset.pattern.permute.xlu1 %v188_v1  ;;  %s166_s3 = scalar_lea.vmem %s141_s2, 128  ;;  %p171_p1 = scmp.lt.s32.totalorder %s141_s2, %s141_s2 }
   0x6   :  { %156 = vmatpush3.msra.mxu0 %v42_v5  ;;  %157 = vmatprep.mubr.msk.f32.mxu0 %vm190_vm0, %v189_v2  ;;  %p167_p0 = scmp.ne.s32.totalorder %s141_s2, %s166_s3  ;;  %p172_p2 = scmp.lt.s32.totalorder %s166_s3, %s166_s3 }
   0x7   :  { %129 = vperm.xlu1 %165, %v126_v6  }
   0x8   :  { %36 = vperm.xlu0 %164, %v34_v4   ;;  %p173_p3 = por %p172_p2, %p171_p1 }
   0xa   :  { %p174_p4 = pnand %p173_p3, %p167_p0 }
   0xb   :  { %v44_v12 = vld [vmem:[#allocation2] sm:$0xff] }
  0x7f   :  { %v32_v8 = vpop.permute.xlu0 %31 }
  0x80   :  { %vm33_vm2 = vcmp.ge.s32.totalorder %v25_v9, %v32_v8 }
  0x82   :  { %v130_v16 = vpop.permute.xlu1 %129 }
  0x83   :  { %v37_v10 = vpop.permute.xlu0 %36 }
  0x84   :  { %vm38_vm3 = vcmp.lt.s32.totalorder %v25_v9, %v37_v10 }
  0x85   :  { %vm39_vm5 = vmand %vm33_vm2, %vm38_vm3 }
  0x86   :  { %v148_v11 = vsel %vm39_vm5, 1.0, %v189_v2 }
  0x87   :  { %158 = vmatmul.mubr.msk.f32.vlgmr.msra.gmra.mxu0 %vm45_vm4, %v148_v11 }
 0x147   :  { %v115_v13 = vpop.f32.mrf.mxu0 }
 0x148   :  { %v119_v14 = vadd.f32 %v115_v13, %v44_v12 }
 0x149   :  { %v159_v15 = vpop.f32.mrf.mxu0 }
 0x14a   :  { %121 = vst.msk [vmem:[#allocation2] sm:$0xff] %vm22_vm1, %v119_v14 }
 0x151   :  { %v125_v17 = vld [vmem:[#allocation2] sm:$0xff] }
 0x152   :  { %v132_v18 = vmul.f32 %v130_v16, %v125_v17 }
 0x154   :  { %133 = vst.msk [vmem:[#allocation3] sm:$0xff] %vm22_vm1, %v132_v18 }
 0x155   :  { %177 = shalt.err (!%p174_p4)
}
 0x156   :  { %143 = dma.vmem_to_hbm [thread:$0]  %s141_s2, 128, %s242_s4, [#allocation4]  }
 0x157   :  { %186 = dma.done.wait [#allocation4], 128  }
 0x158   :  { %187 = vsyncadd [#allocation4], 4294967168 }
 0x159   :  { %147 = vsyncpa [#allocation4], 1 }

</bundles_post_ra>
